<compile_context>
chip_gen: v7x
topology: tpu7x:2x2x1
jax: 0.10.0
libtpu: 0.0.40
codegen_flags: <defaults>
</compile_context>

<pallas_src>
import functools

import jax
import jax.numpy as jnp
from jax import lax
from jax.experimental import pallas as pl
from jax.experimental.pallas import tpu as pltpu

GAMMA = 1.5
ALPHA = 0.25
LANES = 128
SUBLANES = 8
# Neutral pad values: with x=+200, y=1 we get exp(-200) == 0 in f32, hence
# bce = 200 - 200 + log(1+0) == 0 exactly, so the padded loss is exactly 0.
PAD_PRED = 200.0
PAD_TRUE = 1.0


def _round_up(x, m):
    return ((x + m - 1) // m) * m


def _focal_loss_kernel(pred_ref, true_ref, acc_ref, *, gamma, alpha,
                       binary_targets, total_rows, tile_rows, chunk_rows):
    s = pl.program_id(0)

    @pl.when(s == 0)
    def _init():
        acc_ref[...] = jnp.zeros_like(acc_ref)

    n_chunks = tile_rows // chunk_rows
    pieces = chunk_rows // SUBLANES

    def chunk_loss(r0):
        x = pred_ref[pl.ds(r0, chunk_rows), :].astype(jnp.float32)
        y = true_ref[pl.ds(r0, chunk_rows), :].astype(jnp.float32)
        # Numerically stable BCE-with-logits.  log(1+e) (instead of log1p)
        # keeps us on ops guaranteed to lower in Mosaic; its tiny absolute
        # error (<~1e-7, only when e ~ eps) is further crushed by q**gamma.
        e = jnp.exp(-jnp.abs(x))                          # EUP exp (reused below)
        bce = jnp.maximum(x, 0.0) - x * y + jnp.log(1.0 + e)
        if binary_targets:
            # For y in {0,1}: bce == -log(p_t)  =>  1 - p_t = 1 - exp(-bce).
            q = 1.0 - jnp.exp(-bce)                       # EUP exp
        else:
            d = 1.0 + e
            r = pl.reciprocal(d, approx=True)             # EUP vrcp
            r = r * (2.0 - d * r)                         # one Newton step -> ~f32 exact
            sig = jnp.where(x >= 0.0, r, e * r)           # sigmoid(x)
            q = sig * (1.0 - 2.0 * y) + y                 # == 1 - p_t
        q = jnp.maximum(q, 0.0)                           # clamp rounding
        af = (1.0 - alpha) + y * (2.0 * alpha - 1.0)      # alpha_factor, 2 VALU ops
        if gamma == 0.0:
            mod = jnp.ones_like(q)
        elif gamma == 1.0:
            mod = q
        elif gamma == 1.5:
            mod = q * jnp.sqrt(q)                         # EUP sqrt; no pow / log(0)
        elif gamma == 2.0:
            mod = q * q
        else:
            mod = jnp.where(q > 0.0, jnp.where(q > 0.0, q, 1.0) ** gamma, 0.0)
        return bce * (af * mod)

    def fold_into_acc(loss):
        # VPU-only tree fold (chunk_rows,128) -> (8,128); static sublane-aligned
        # slices only; a single += into the resident VMEM accumulator output.
        parts = [loss[k * SUBLANES:(k + 1) * SUBLANES, :] for k in range(pieces)]
        while len(parts) > 1:
            nxt = [a + b for a, b in zip(parts[0::2], parts[1::2])]
            if len(parts) % 2:
                nxt.append(parts[-1])
            parts = nxt
        acc_ref[...] += parts[0]

    def full_body(c, carry):
        r0 = pl.multiple_of(c * chunk_rows, chunk_rows)
        fold_into_acc(chunk_loss(r0))
        return carry

    if total_rows % tile_rows == 0:
        # Every grid block is full: no masking anywhere in the kernel.
        lax.fori_loop(0, n_chunks, full_body, 0, unroll=True)
    else:
        valid_rows = total_rows - s * tile_rows           # real rows in this block

        @pl.when(valid_rows >= tile_rows)                 # all interior blocks
        def _full_tile():
            lax.fori_loop(0, n_chunks, full_body, 0, unroll=True)

        @pl.when(valid_rows < tile_rows)                  # last (partial) block only
        def _partial_tile():
            def body(c, carry):
                r0 = pl.multiple_of(c * chunk_rows, chunk_rows)
                loss = chunk_loss(r0)
                row = lax.broadcasted_iota(jnp.int32, loss.shape, 0) + c * chunk_rows
                fold_into_acc(jnp.where(row < valid_rows, loss, 0.0))
                return carry
            lax.fori_loop(0, n_chunks, body, 0, unroll=True)


def focal_loss(pred, true, *, gamma=GAMMA, alpha=ALPHA, reduction="mean",
               binary_targets=False, tile_rows=1024, chunk_rows=64):
    """Focal loss over BCEWithLogitsLoss.  `pred`, `true`: same shape.

    `pred`/`true` may be bf16 to halve HBM traffic (helps HBM-bound v5e); all
    math is done in f32 inside the kernel.  Set `binary_targets=True` when
    targets are exactly {0,1} to use the cheaper q = 1 - exp(-bce) path
    (v6e/v7x are VALU-slot-bound for this kernel).
    """
    assert pred.shape == true.shape
    if reduction not in ("mean", "sum"):
        # TODO(synk): reduction='none' (unreduced elementwise output) not implemented.
        raise NotImplementedError("reduction must be 'mean' or 'sum'")

    total = pred.size
    granule = SUBLANES * LANES                    # 1024 elements
    padded = _round_up(total, granule)
    rows = padded // LANES                        # always a multiple of 8

    flat_pred = pred.reshape(-1)                  # free reshape
    flat_true = true.reshape(-1)
    if padded != total:
        # TODO(synk): this pad is still one full HBM copy; a manual-DMA ragged
        # tail over the unpadded array would remove it entirely.  Pad values
        # are neutral (loss == 0 exactly) so no in-kernel mask is needed.
        padn = padded - total
        flat_pred = jnp.pad(flat_pred, (0, padn), constant_values=PAD_PRED)
        flat_true = jnp.pad(flat_true, (0, padn), constant_values=PAD_TRUE)
    pred2d = flat_pred.reshape(rows, LANES)
    true2d = flat_true.reshape(rows, LANES)

    tr = min(tile_rows, rows)                     # multiple of 8
    cr = chunk_rows if tr % chunk_rows == 0 else SUBLANES
    steps = pl.cdiv(rows, tr)

    kernel = functools.partial(
        _focal_loss_kernel, gamma=gamma, alpha=alpha,
        binary_targets=binary_targets, total_rows=rows,
        tile_rows=tr, chunk_rows=cr)

    in_bytes = total * (pred.dtype.itemsize + true.dtype.itemsize)
    cost = pl.CostEstimate(
        flops=(14 if binary_targets else 22) * total,
        transcendentals=4 * total,
        bytes_accessed=in_bytes + SUBLANES * LANES * 4)

    # TODO(synk): on v7x, shard a leading grid axis of size 2 across the two
    # TensorCores with pltpu.CORE_PARALLEL once verified on hardware.
    partials = pl.pallas_call(
        kernel,
        out_shape=jax.ShapeDtypeStruct((SUBLANES, LANES), jnp.float32),
        grid_spec=pltpu.PrefetchScalarGridSpec(
            num_scalar_prefetch=0,
            grid=(steps,),
            in_specs=[
                pl.BlockSpec((tr, LANES), lambda s: (s, 0)),
                pl.BlockSpec((tr, LANES), lambda s: (s, 0)),
            ],
            out_specs=pl.BlockSpec((SUBLANES, LANES), lambda s: (0, 0)),
        ),
        compiler_params=pltpu.CompilerParams(
            dimension_semantics=("arbitrary",)),
        cost_estimate=cost,
    )(pred2d, true2d)

    total_sum = jnp.sum(partials, dtype=jnp.float32)
    if reduction == "mean":
        return total_sum / jnp.float32(total)
    return total_sum


def _focal_loss_ref(pred, true, gamma=GAMMA, alpha=ALPHA):
    x = pred.astype(jnp.float32)
    y = true.astype(jnp.float32)
    bce = jnp.maximum(x, 0.0) - x * y + jnp.log1p(jnp.exp(-jnp.abs(x)))
    p = jax.nn.sigmoid(x)
    p_t = y * p + (1.0 - y) * (1.0 - p)
    af = y * alpha + (1.0 - y) * (1.0 - alpha)
    mf = (1.0 - p_t) ** gamma
    return jnp.mean(bce * af * mf)


if __name__ == "__main__":
    key = jax.random.PRNGKey(0)
    k1, k2, k3, k4 = jax.random.split(key, 4)

    # Detection-head style usage: logits + {0,1} targets.  2048 elements is a
    # multiple of 1024 -> zero-copy wrapper path; binary fast path; targets
    # shipped as bf16 ({0,1} is exact in bf16) to halve their HBM traffic.
    B, C, H, W = 2, 4, 16, 16
    pred = jax.random.normal(k1, (B, C, H, W), dtype=jnp.float32) * 2.0
    true = (jax.random.uniform(k2, (B, C, H, W)) > 0.7).astype(jnp.float32)
    out = focal_loss(pred, true.astype(jnp.bfloat16), binary_targets=True)
    out = jax.block_until_ready(out)
    ref = _focal_loss_ref(pred, true)
    assert jnp.allclose(out, ref, rtol=1e-5, atol=1e-5), (out, ref)

    # Element count NOT a multiple of 1024 (exercises the neutral-padding path)
    # with soft targets (exercises the general sigmoid / p_t path).
    pred2 = jax.random.normal(k3, (2, 3, 15, 17), dtype=jnp.float32) * 2.0
    true2 = jax.random.uniform(k4, (2, 3, 15, 17), dtype=jnp.float32)
    out2 = jax.block_until_ready(focal_loss(pred2, true2))
    ref2 = _focal_loss_ref(pred2, true2)
    assert jnp.allclose(out2, ref2, rtol=1e-5, atol=1e-5), (out2, ref2)

    print("KERNEL_OK")
</pallas_src>

<mosaic_0001>
module attributes {stable_mosaic.version = 11 : i64} {
  func.func @_focal_loss_kernel(%arg0: i32, %arg1: memref<16x128xf32, #tpu.memory_space<vmem>>, %arg2: memref<16x128xbf16, #tpu.memory_space<vmem>>, %arg3: memref<8x128xf32, #tpu.memory_space<vmem>>) attributes {dimension_semantics = [#tpu.dimension_semantics<arbitrary>], iteration_bounds = array<i64: 1>, scalar_prefetch = 0 : i64, scratch_operands = 0 : i64, tpu.core_type = #tpu.core_type<tc>, window_params = [{transform_indices = @transform_0, window_bounds = array<i64: 16, 128>}, {transform_indices = @transform_1, window_bounds = array<i64: 16, 128>}, {pipeline_mode = #tpu.pipeline_mode<synchronous>, transform_indices = @transform_2, window_bounds = array<i64: 8, 128>}]} {
    %c0_i32 = arith.constant 0 : i32
    %0 = arith.cmpi eq, %arg0, %c0_i32 : i32
    %1 = arith.extui %0 : i1 to i32
    %c0_i32_0 = arith.constant 0 : i32
    %2 = arith.cmpi ne, %1, %c0_i32_0 : i32
    scf.if %2 {
      %cst_29 = arith.constant 0.000000e+00 : f32
      %77 = vector.broadcast %cst_29 : f32 to vector<8x128xf32>
      %c0_30 = arith.constant 0 : index
      %c0_31 = arith.constant 0 : index
      %78 = vector.load %arg3[%c0_30, %c0_31] : memref<8x128xf32, #tpu.memory_space<vmem>>, vector<8x128xf32>
      tpu.vector_store %arg3[%c0_30, %c0_31], %77 {strides = array<i32>} : memref<8x128xf32, #tpu.memory_space<vmem>>, vector<8x128xf32>,
    } else {
    }
    %c0_i32_1 = arith.constant 0 : i32
    %c8_i32 = arith.constant 8 : i32
    %3 = arith.muli %c0_i32_1, %c8_i32 : i32
    %4 = tpu.assume_multiple %3, 8 : i32
    %5 = arith.index_cast %4 : i32 to index
    %c0 = arith.constant 0 : index
    %6 = vector.load %arg1[%5, %c0] : memref<16x128xf32, #tpu.memory_space<vmem>>, vector<8x128xf32>
    %7 = arith.index_cast %4 : i32 to index
    %c0_2 = arith.constant 0 : index
    %8 = vector.load %arg2[%7, %c0_2] : memref<16x128xbf16, #tpu.memory_space<vmem>>, vector<8x128xbf16>
    %9 = arith.extf %8 : vector<8x128xbf16> to vector<8x128xf32>
    %10 = math.absf %6 : vector<8x128xf32>
    %cst = arith.constant 0.000000e+00 : f32
    %11 = vector.broadcast %cst : f32 to vector<8x128xf32>
    %12 = arith.subf %11, %10 : vector<8x128xf32>
    %13 = math.exp %12 : vector<8x128xf32>
    %cst_3 = arith.constant 0.000000e+00 : f32
    %14 = vector.broadcast %cst_3 : f32 to vector<8x128xf32>
    %15 = arith.maximumf %6, %14 : vector<8x128xf32>
    %16 = arith.mulf %6, %9 : vector<8x128xf32>
    %17 = arith.subf %15, %16 : vector<8x128xf32>
    %cst_4 = arith.constant 1.000000e+00 : f32
    %18 = vector.broadcast %cst_4 : f32 to vector<8x128xf32>
    %19 = arith.addf %18, %13 : vector<8x128xf32>
    %20 = math.log %19 : vector<8x128xf32>
    %21 = arith.addf %17, %20 : vector<8x128xf32>
    %cst_5 = arith.constant 0.000000e+00 : f32
    %22 = vector.broadcast %cst_5 : f32 to vector<8x128xf32>
    %23 = arith.subf %22, %21 : vector<8x128xf32>
    %24 = math.exp %23 : vector<8x128xf32>
    %cst_6 = arith.constant 1.000000e+00 : f32
    %25 = vector.broadcast %cst_6 : f32 to vector<8x128xf32>
    %26 = arith.subf %25, %24 : vector<8x128xf32>
    %cst_7 = arith.constant 0.000000e+00 : f32
    %27 = vector.broadcast %cst_7 : f32 to vector<8x128xf32>
    %28 = arith.maximumf %26, %27 : vector<8x128xf32>
    %cst_8 = arith.constant -5.000000e-01 : f32
    %29 = vector.broadcast %cst_8 : f32 to vector<8x128xf32>
    %30 = arith.mulf %9, %29 : vector<8x128xf32>
    %cst_9 = arith.constant 7.500000e-01 : f32
    %31 = vector.broadcast %cst_9 : f32 to vector<8x128xf32>
    %32 = arith.addf %31, %30 : vector<8x128xf32>
    %33 = math.sqrt %28 : vector<8x128xf32>
    %34 = arith.mulf %28, %33 : vector<8x128xf32>
    %35 = arith.mulf %32, %34 : vector<8x128xf32>
    %36 = arith.mulf %21, %35 : vector<8x128xf32>
    %c0_10 = arith.constant 0 : index
    %c0_11 = arith.constant 0 : index
    %37 = vector.load %arg3[%c0_10, %c0_11] : memref<8x128xf32, #tpu.memory_space<vmem>>, vector<8x128xf32>
    %38 = arith.addf %37, %36 : vector<8x128xf32>
    %c0_12 = arith.constant 0 : index
    %c0_13 = arith.constant 0 : index
    %39 = vector.load %arg3[%c0_12, %c0_13] : memref<8x128xf32, #tpu.memory_space<vmem>>, vector<8x128xf32>
    tpu.vector_store %arg3[%c0_12, %c0_13], %38 {strides = array<i32>} : memref<8x128xf32, #tpu.memory_space<vmem>>, vector<8x128xf32>,
    %c1_i32 = arith.constant 1 : i32
    %c8_i32_14 = arith.constant 8 : i32
    %40 = arith.muli %c1_i32, %c8_i32_14 : i32
    %41 = tpu.assume_multiple %40, 8 : i32
    %42 = arith.index_cast %41 : i32 to index
    %c0_15 = arith.constant 0 : index
    %43 = vector.load %arg1[%42, %c0_15] : memref<16x128xf32, #tpu.memory_space<vmem>>, vector<8x128xf32>
    %44 = arith.index_cast %41 : i32 to index
    %c0_16 = arith.constant 0 : index
    %45 = vector.load %arg2[%44, %c0_16] : memref<16x128xbf16, #tpu.memory_space<vmem>>, vector<8x128xbf16>
    %46 = arith.extf %45 : vector<8x128xbf16> to vector<8x128xf32>
    %47 = math.absf %43 : vector<8x128xf32>
    %cst_17 = arith.constant 0.000000e+00 : f32
    %48 = vector.broadcast %cst_17 : f32 to vector<8x128xf32>
    %49 = arith.subf %48, %47 : vector<8x128xf32>
    %50 = math.exp %49 : vector<8x128xf32>
    %cst_18 = arith.constant 0.000000e+00 : f32
    %51 = vector.broadcast %cst_18 : f32 to vector<8x128xf32>
    %52 = arith.maximumf %43, %51 : vector<8x128xf32>
    %53 = arith.mulf %43, %46 : vector<8x128xf32>
    %54 = arith.subf %52, %53 : vector<8x128xf32>
    %cst_19 = arith.constant 1.000000e+00 : f32
    %55 = vector.broadcast %cst_19 : f32 to vector<8x128xf32>
    %56 = arith.addf %55, %50 : vector<8x128xf32>
    %57 = math.log %56 : vector<8x128xf32>
    %58 = arith.addf %54, %57 : vector<8x128xf32>
    %cst_20 = arith.constant 0.000000e+00 : f32
    %59 = vector.broadcast %cst_20 : f32 to vector<8x128xf32>
    %60 = arith.subf %59, %58 : vector<8x128xf32>
    %61 = math.exp %60 : vector<8x128xf32>
    %cst_21 = arith.constant 1.000000e+00 : f32
    %62 = vector.broadcast %cst_21 : f32 to vector<8x128xf32>
    %63 = arith.subf %62, %61 : vector<8x128xf32>
    %cst_22 = arith.constant 0.000000e+00 : f32
    %64 = vector.broadcast %cst_22 : f32 to vector<8x128xf32>
    %65 = arith.maximumf %63, %64 : vector<8x128xf32>
    %cst_23 = arith.constant -5.000000e-01 : f32
    %66 = vector.broadcast %cst_23 : f32 to vector<8x128xf32>
    %67 = arith.mulf %46, %66 : vector<8x128xf32>
    %cst_24 = arith.constant 7.500000e-01 : f32
    %68 = vector.broadcast %cst_24 : f32 to vector<8x128xf32>
    %69 = arith.addf %68, %67 : vector<8x128xf32>
    %70 = math.sqrt %65 : vector<8x128xf32>
    %71 = arith.mulf %65, %70 : vector<8x128xf32>
    %72 = arith.mulf %69, %71 : vector<8x128xf32>
    %73 = arith.mulf %58, %72 : vector<8x128xf32>
    %c0_25 = arith.constant 0 : index
    %c0_26 = arith.constant 0 : index
    %74 = vector.load %arg3[%c0_25, %c0_26] : memref<8x128xf32, #tpu.memory_space<vmem>>, vector<8x128xf32>
    %75 = arith.addf %74, %73 : vector<8x128xf32>
    %c0_27 = arith.constant 0 : index
    %c0_28 = arith.constant 0 : index
    %76 = vector.load %arg3[%c0_27, %c0_28] : memref<8x128xf32, #tpu.memory_space<vmem>>, vector<8x128xf32>
    tpu.vector_store %arg3[%c0_27, %c0_28], %75 {strides = array<i32>} : memref<8x128xf32, #tpu.memory_space<vmem>>, vector<8x128xf32>,
    %c2_i32 = arith.constant 2 : i32
    return
  }
  func.func @transform_0(%arg0: i32) -> (i32, i32) {
    %c0_i32 = arith.constant 0 : i32
    %c0_i32_0 = arith.constant 0 : i32
    return %arg0, %c0_i32 : i32, i32
  }
  func.func @transform_1(%arg0: i32) -> (i32, i32) {
    %c0_i32 = arith.constant 0 : i32
    %c0_i32_0 = arith.constant 0 : i32
    return %arg0, %c0_i32 : i32, i32
  }
  func.func @transform_2(%arg0: i32) -> (i32, i32) {
    %c0_i32 = arith.constant 0 : i32
    %c0_i32_0 = arith.constant 0 : i32
    %c0_i32_1 = arith.constant 0 : i32
    return %c0_i32, %c0_i32_0 : i32, i32
  }
}

</mosaic_0001>

<bundles_post_ra>
// kernel: tpu_custom_call.1
= control target key start
LH: loop header
LB: loop body
LE: loop exit
PB: predicated region body
PF: predicated region fallthrough
CT: control target
= control target key end

     0   :  { %7 = vsyncpa [#allocation3], 0  ;;  %s285_s0 = inlined_call_operand.hbm [shape: f32[16,128], index: 0, kind: input, shape index: {}]   ;;  %s286_s1 = inlined_call_operand.hbm [shape: bf16[16,128], index: 1, kind: input, shape index: {}]   ;;  %s287_s2 = inlined_call_operand.hbm [shape: f32[8,128], index: 2, kind: output, shape index: {}]  }
   0x1   :  { %8 = vsyncpa [#allocation6], 0 }
   0x2   :  { %9 = vsyncpa [#allocation4], 0  ;;  %s227_s9 = smov [#allocation2]   ;;  %s155_s13 = scalar_lea.hbm %s285_s0, 256 }
   0x3   :  { %s15_s10 = sshll.u32 %s227_s9, 4  ;;  %p156_p0 = scmp.ne.s32.totalorder %s285_s0, %s155_s13  ;;  %s16_s10 = int_to_ptr.vmem [resolvable:$true] %s15_s10 }
   0x4   :  { %p159_p1 = scmp.lt.u32.totalorder %s155_s13, %s285_s0 }
   0x6   :  { %p161_p2 = pnand %p159_p1, %p156_p0 }
   0x8   :  { %164 = shalt.err (!%p161_p2)
}
   0x9   :  { %s165_s18 = scalar_lea.vmem %s16_s10, 256  ;;  %p170_p4 = scmp.lt.s32.totalorder %s16_s10, %s16_s10 }
   0xa   :  { %p166_p3 = scmp.ne.s32.totalorder %s16_s10, %s165_s18  ;;  %p171_p5 = scmp.lt.s32.totalorder %s165_s18, %s165_s18 }
   0xc   :  { %p172_p6 = por %p171_p5, %p170_p4 }
   0xe   :  { %p173_p7 = pnand %p172_p6, %p166_p3 }
  0x10   :  { %176 = shalt.err (!%p173_p7)
}
  0x11   :  { %s228_s19 = smov 128   ;;  %s229_s20 = smov 8  }
  0x12   :  { %21 = dma.hbm_to_vmem [thread:$0]  %s285_s0, 256, %s16_s10, [#allocation3], %s228_s19, %s228_s19, %s229_s20  }
  0x13   :  { %s230_s23 = smov [#allocation5]   ;;  %s177_s27 = scalar_lea.hbm %s286_s1, 128 }
  0x14   :  { %s27_s24 = sshll.u32 %s230_s23, 4  ;;  %p178_p8 = scmp.ne.s32.totalorder %s286_s1, %s177_s27  ;;  %s28_s24 = int_to_ptr.vmem [resolvable:$true] %s27_s24 }
  0x15   :  { %p181_p9 = scmp.lt.u32.totalorder %s177_s27, %s286_s1 }
  0x17   :  { %p183_p10 = pnand %p181_p9, %p178_p8 }
  0x19   :  { %186 = shalt.err (!%p183_p10)
}
  0x1a   :  { %s187_s4 = scalar_lea.vmem %s28_s24, 128  ;;  %p192_p12 = scmp.lt.s32.totalorder %s28_s24, %s28_s24 }
  0x1b   :  { %p188_p11 = scmp.ne.s32.totalorder %s28_s24, %s187_s4  ;;  %p193_p13 = scmp.lt.s32.totalorder %s187_s4, %s187_s4 }
  0x1d   :  { %p194_p0 = por %p193_p13, %p192_p12 }
  0x1f   :  { %p195_p1 = pnand %p194_p0, %p188_p11 }
  0x21   :  { %198 = shalt.err (!%p195_p1)
}
  0x22   :  { %s231_s0 = smov 64   ;;  %s232_s5 = smov 4  }
  0x23   :  { %33 = dma.hbm_to_vmem [thread:$0]  %s286_s1, 128, %s28_s24, [#allocation6], %s231_s0, %s231_s0, %s232_s5  }
  0x24   :  { %221 = dma.done.wait [#allocation3], 256  }
  0x25   :  { %222 = vsyncadd [#allocation3], 4294967040 }
  0x26   :  { %223 = dma.done.wait [#allocation6], 128  }
  0x27   :  { %224 = vsyncadd [#allocation6], 4294967168  ;;  %v45_v0 = vld [vmem:[#allocation2] sm:$0xff]  ;;  %v80_v1 = vld [vmem:[#allocation2 + $0x8] sm:$0xff]  ;;  %s233_s1 = smov [#allocation7]  }
  0x28   :  { %v48_v2 = vand.u32 2147483647, %v45_v0  ;;  %v84_v3 = vand.u32 2147483647, %v80_v1  ;;  %v46_v10 = vld [vmem:[#allocation5] sm:$0xff]   ;;  %v52_v15 = vmax.f32 %v45_v0, 0.0 }
  0x29   :  { %v47_v13 = vunpack.c.l.bf16 %v46_v10  ;;  %v83_v14 = vunpack.c.h.bf16 %v46_v10  ;;  %v88_v17 = vmax.f32 %v80_v1, 0.0  ;;  %s121_s8 = sshll.u32 %s233_s1, 4  ;;  %s122_s8 = int_to_ptr.vmem [resolvable:$true] %s121_s8 }
  0x2a   :  { %v49_v4 = vsub.f32 0.0, %v48_v2  ;;  %v85_v5 = vsub.f32 0.0, %v84_v3  ;;  %s199_s9 = scalar_lea.vmem %s122_s8, 128  ;;  %p204_p3 = scmp.lt.s32.totalorder %s122_s8, %s122_s8 }
  0x2b   :  { %v53_v16 = vmul.f32 %v47_v13, %v45_v0  ;;  %v89_v18 = vmul.f32 %v83_v14, %v80_v1  ;;  %v64_v37 = vmul.f32 -0.5, %v47_v13  ;;  %v100_v40 = vmul.f32 -0.5, %v83_v14  ;;  %p200_p2 = scmp.ne.s32.totalorder %s122_s8, %s199_s9  ;;  %p205_p4 = scmp.lt.s32.totalorder %s199_s9, %s199_s9 }
  0x2c   :  { %v50_v6 = vmul.f32 1.442695, %v49_v4  ;;  %v86_v7 = vmul.f32 1.442695, %v85_v5 }
  0x2d   :  { %v54_v19 = vsub.f32 %v52_v15, %v53_v16  ;;  %v90_v21 = vsub.f32 %v88_v17, %v89_v18  ;;  %v65_v45 = vadd.f32 0.75, %v64_v37  ;;  %v101_v48 = vadd.f32 0.75, %v100_v40  ;;  %p206_p5 = por %p205_p4, %p204_p3 }
  0x2e   :  { %139 = vpow2.f32 %v50_v6 }
  0x2f   :  { %141 = vpow2.f32 %v86_v7  ;;  %p207_p6 = pnand %p206_p5, %p200_p2 }
  0x38   :  { %v140_v8 = vpop.eup %139 }
  0x39   :  { %v142_v9 = vpop.eup %141  ;;  %v55_v11 = vadd.f32 1.0, %v140_v8 }
  0x3a   :  { %v91_v12 = vadd.f32 1.0, %v142_v9 }
  0x3b   :  { %143 = vlog2.f32 %v55_v11 }
  0x3c   :  { %145 = vlog2.f32 %v91_v12 }
  0x45   :  { %v144_v20 = vpop.eup %143 }
  0x46   :  { %v146_v22 = vpop.eup %145  ;;  %v57_v23 = vmul.f32 0.6931472, %v144_v20 }
  0x47   :  { %v93_v24 = vmul.f32 0.6931472, %v146_v22 }
  0x48   :  { %v58_v25 = vadd.f32 %v57_v23, %v54_v19 }
  0x49   :  { %v94_v26 = vadd.f32 %v93_v24, %v90_v21 }
  0x4a   :  { %v59_v27 = vsub.f32 0.0, %v58_v25 }
  0x4b   :  { %v95_v28 = vsub.f32 0.0, %v94_v26 }
  0x4c   :  { %v60_v29 = vmul.f32 1.442695, %v59_v27 }
  0x4d   :  { %v96_v30 = vmul.f32 1.442695, %v95_v28 }
  0x4e   :  { %147 = vpow2.f32 %v60_v29 }
  0x4f   :  { %149 = vpow2.f32 %v96_v30 }
  0x58   :  { %v148_v31 = vpop.eup %147 }
  0x59   :  { %v150_v32 = vpop.eup %149  ;;  %v62_v33 = vsub.f32 1.0, %v148_v31 }
  0x5a   :  { %v98_v34 = vsub.f32 1.0, %v150_v32 }
  0x5b   :  { %v63_v35 = vmax.f32 %v62_v33, 0.0 }
  0x5c   :  { %v99_v36 = vmax.f32 %v98_v34, 0.0 }
  0x5d   :  { %151 = vrsqrt.f32 %v63_v35  ;;  %vm68_vm0 = vcmp.eq.f32.partialorder %v63_v35, inf  ;;  %v71_v39 = vand.u32 2147483648, %v63_v35  ;;  %vm70_vm1 = vcmp.eq.f32.partialorder %v63_v35, 0.0 }
  0x5e   :  { %153 = vrsqrt.f32 %v99_v36  ;;  %vm104_vm2 = vcmp.eq.f32.partialorder %v99_v36, inf  ;;  %v107_v43 = vand.u32 2147483648, %v99_v36  ;;  %vm106_vm3 = vcmp.eq.f32.partialorder %v99_v36, 0.0 }
  0x67   :  { %v152_v38 = vpop.eup %151 }
  0x68   :  { %v154_v41 = vpop.eup %153  ;;  %v67_v42 = vmul.f32 %v152_v38, %v63_v35 }
  0x69   :  { %v103_v44 = vmul.f32 %v154_v41, %v99_v36 }
  0x6a   :  { %v69_v46 = vsel %vm68_vm0, %v63_v35, %v67_v42 }
  0x6b   :  { %v72_v47 = vsel %vm70_vm1, %v71_v39, %v69_v46  ;;  %v105_v49 = vsel %vm104_vm2, %v99_v36, %v103_v44 }
  0x6c   :  { %v73_v50 = vmul.f32 %v72_v47, %v63_v35  ;;  %v108_v51 = vsel %vm106_vm3, %v107_v43, %v105_v49 }
  0x6d   :  { %v109_v52 = vmul.f32 %v108_v51, %v99_v36 }
  0x6e   :  { %v74_v53 = vmul.f32 %v73_v50, %v65_v45 }
  0x6f   :  { %v110_v54 = vmul.f32 %v109_v52, %v101_v48 }
  0x70   :  { %v75_v55 = vmul.f32 %v74_v53, %v58_v25 }
  0x71   :  { %v111_v56 = vmul.f32 %v110_v54, %v94_v26 }
  0x73   :  { %v113_v57 = vadd.f32 %v111_v56, %v75_v55 }
  0x75   :  { %114 = vst [vmem:[#allocation7] sm:$0xff] %v113_v57 }
  0x76   :  { %210 = shalt.err (!%p207_p6)
}
  0x77   :  { %s211_s12 = scalar_lea.hbm %s287_s2, 128 }
  0x78   :  { %p212_p7 = scmp.ne.s32.totalorder %s287_s2, %s211_s12  ;;  %p215_p8 = scmp.lt.u32.totalorder %s211_s12, %s287_s2 }
  0x7a   :  { %p217_p9 = pnand %p215_p8, %p212_p7 }
  0x7c   :  { %220 = shalt.err (!%p217_p9)
}
  0x7d   :  { %124 = dma.vmem_to_hbm [thread:$0]  %s122_s8, 128, %s287_s2, [#allocation4]  }
  0x7e   :  { %225 = dma.done.wait [#allocation4], 128  }
  0x7f   :  { %226 = vsyncadd [#allocation4], 4294967168 }
  0x80   :  { %128 = vsyncpa [#allocation3], 1 }
  0x81   :  { %129 = vsyncpa [#allocation6], 1 }
  0x82   :  { %130 = vsyncpa [#allocation4], 1 }

</bundles_post_ra>
